<compile_context>
chip_gen: v5e
topology: v5e:2x2
jax: 0.10.0
libtpu: 0.0.40
codegen_flags: <defaults>
</compile_context>

<pallas_src>
import jax
import jax.numpy as jnp
from jax.experimental import pallas as pl
from jax.experimental.pallas import tpu as pltpu

_MIB = 1024 * 1024


def _vmem_capacity_bytes():
    """Physical VMEM per TensorCore; fall back to the smallest (v7x) if unknown."""
    try:
        return int(pltpu.get_tpu_info().vmem_capacity_bytes)
    except Exception:
        return 64 * _MIB


def _round_down_mult(x, m):
    return max((x // m) * m, m)


def _pick_hidden_tile(dim, wbytes, budget, max_tn):
    """Largest multiple of 128 dividing dim whose W1/W2 blocks fit half the budget."""
    best = 128
    limit = min(dim, max(max_tn, 128))
    for t in range(128, limit + 1, 128):
        if dim % t == 0 and 4 * dim * t * wbytes <= budget // 2:
            best = t
    return best


def _resblock_resident_kernel(x_ref, w1_ref, b1_ref, w2_ref, b2_ref, o_ref):
    """Whole (dim, dim) weights resident in VMEM; one (tm, dim) row tile per step."""
    x = x_ref[...]
    # h = relu(x @ W1 + b1), f32 accumulation on the MXU.
    h = jnp.dot(x.astype(w1_ref.dtype), w1_ref[...],
                preferred_element_type=jnp.float32)
    h = jnp.maximum(h + b1_ref[...], 0.0)
    # TODO(synk): training-mode dropout would draw a pltpu.stateful_bernoulli
    # mask here; identity at inference / p=0.
    y = jnp.dot(h.astype(w2_ref.dtype), w2_ref[...],
                preferred_element_type=jnp.float32)
    o_ref[...] = (y + b2_ref[...] + x.astype(jnp.float32)).astype(o_ref.dtype)


def _resblock_tiled_kernel(x_ref, w1_ref, b1_ref, w2_ref, b2_ref, o_ref, acc_ref):
    """Hidden-dim tiled: accumulate relu(x@W1_j + b1_j) @ W2_j into f32 scratch."""
    j = pl.program_id(1)
    x = x_ref[...]

    @pl.when(j == 0)
    def _():
        acc_ref[...] = x.astype(jnp.float32) + b2_ref[...]

    h = jnp.dot(x.astype(w1_ref.dtype), w1_ref[...],
                preferred_element_type=jnp.float32)
    h = jnp.maximum(h + b1_ref[...], 0.0)
    acc_ref[...] += jnp.dot(h.astype(w2_ref.dtype), w2_ref[...],
                            preferred_element_type=jnp.float32)

    @pl.when(j == pl.num_programs(1) - 1)
    def _():
        o_ref[...] = acc_ref[...].astype(o_ref.dtype)


def res_block(x, w1, b1, w2, b2, *, weights_dtype=None):
    """Pallas ResBlock forward: relu(x @ W1^T + b1) @ W2^T + b2 + x.

    x  : (..., dim)    input (any number of leading dims)
    w1 : (dim, dim)    torch nn.Linear weight, (out, in) layout
    b1 : (dim,)
    w2 : (dim, dim)    torch nn.Linear weight, (out, in) layout
    b2 : (dim,)
    weights_dtype : optional one-time weight cast (e.g. jnp.bfloat16) for f32
        models; MXU accumulation stays f32.
    """
    orig_shape = x.shape
    dim = orig_shape[-1]
    assert w1.shape == (dim, dim) and w2.shape == (dim, dim)
    assert b1.shape == (dim,) and b2.shape == (dim,)

    x2 = x.reshape(-1, dim)
    rows = x2.shape[0]

    # One-time layout prep outside the kernel: (out, in) -> (in, out) so the
    # kernel contracts on the minor dim; biases as (1, dim) f32 slabs so there
    # are no per-step converts in the epilogue.
    w1_t = jnp.asarray(w1).T
    w2_t = jnp.asarray(w2).T
    if weights_dtype is not None:
        w1_t = w1_t.astype(weights_dtype)
        w2_t = w2_t.astype(weights_dtype)
    b1_f32 = jnp.asarray(b1, jnp.float32).reshape(1, dim)
    b2_f32 = jnp.asarray(b2, jnp.float32).reshape(1, dim)

    xbytes = jnp.dtype(x.dtype).itemsize
    wbytes = jnp.dtype(w1_t.dtype).itemsize

    cap = _vmem_capacity_bytes()
    budget = int(cap * 0.6)  # sizing budget; leaves headroom for compiler temps

    # Per-row VMEM: double-buffered in & out tiles + f32 temporaries (h, y, acc).
    per_row = dim * (2 * xbytes + 2 * xbytes + 3 * 4)

    # Resident-weight path cost: both (dim, dim) weights, conservatively
    # counted as double-buffered, plus f32 biases.
    resident_fixed = 4 * dim * dim * wbytes + 4 * dim * 4
    resident_fits = resident_fixed + min(max(rows, 8), 256) * per_row <= budget

    tiled_ok = (dim % 128 == 0) and dim >= 256
    # Decode-like calls (all rows in one tile) leave the full weight DMA
    # exposed on the resident path; prefer the tiled path so weight-block DMAs
    # overlap the matmuls.
    decode_like = rows <= 512 and dim >= 1024
    use_tiled = tiled_ok and ((not resident_fits) or decode_like)

    if not use_tiled:
        # ---------------- resident-weight path ----------------
        # NOTE: if dim is not a multiple of 128 and the weights do not fit,
        # this path may still VMEM-OOM at compile time; production dims are
        # expected to be 128-aligned (see review).
        avail = max(budget - resident_fixed, 8 * per_row)
        tm = _round_down_mult(min(avail // per_row, 1024), 8)
        if rows <= tm:
            tm = rows  # full-rows block (escapes the (8,128) rule)
        grid = (pl.cdiv(rows, tm),)

        in_specs = [
            pl.BlockSpec((tm, dim), lambda i: (i, 0)),
            pl.BlockSpec((dim, dim), lambda i: (0, 0)),  # resident across grid
            pl.BlockSpec((1, dim), lambda i: (0, 0)),
            pl.BlockSpec((dim, dim), lambda i: (0, 0)),  # resident across grid
            pl.BlockSpec((1, dim), lambda i: (0, 0)),
        ]
        out_specs = pl.BlockSpec((tm, dim), lambda i: (i, 0))
        scratch_shapes = ()
        kernel = _resblock_resident_kernel
        dim_sem = ("parallel",)
        est = resident_fixed + tm * per_row
    else:
        # ---------------- hidden-dim tiled path ----------------
        max_tn = dim // 4 if (decode_like and dim // 4 >= 128) else dim
        tn = _pick_hidden_tile(dim, wbytes, budget, max_tn)
        weight_bytes = 4 * dim * tn * wbytes  # W1 + W2 blocks, double-buffered
        per_row_t = per_row + tn * 4
        avail = max(budget - weight_bytes, 8 * per_row_t)
        tm = _round_down_mult(min(avail // per_row_t, 512), 8)
        if rows <= tm:
            tm = rows
        grid = (pl.cdiv(rows, tm), dim // tn)

        in_specs = [
            pl.BlockSpec((tm, dim), lambda i, j: (i, 0)),
            pl.BlockSpec((dim, tn), lambda i, j: (0, j)),
            pl.BlockSpec((1, tn), lambda i, j: (0, j)),
            pl.BlockSpec((tn, dim), lambda i, j: (j, 0)),
            pl.BlockSpec((1, dim), lambda i, j: (0, 0)),
        ]
        out_specs = pl.BlockSpec((tm, dim), lambda i, j: (i, 0))
        scratch_shapes = (pltpu.VMEM((tm, dim), jnp.float32),)
        kernel = _resblock_tiled_kernel
        dim_sem = ("parallel", "arbitrary")
        est = weight_bytes + tm * per_row_t

    vmem_limit = int(min(cap * 0.95, max(2 * est, 32 * _MIB)))

    out2 = pl.pallas_call(
        kernel,
        out_shape=jax.ShapeDtypeStruct((rows, dim), x.dtype),
        grid_spec=pltpu.PrefetchScalarGridSpec(
            num_scalar_prefetch=0,
            grid=grid,
            in_specs=in_specs,
            out_specs=out_specs,
            scratch_shapes=scratch_shapes,
        ),
        compiler_params=pltpu.CompilerParams(
            dimension_semantics=dim_sem,
            vmem_limit_bytes=vmem_limit,
        ),
    )(x2, w1_t, b1_f32, w2_t, b2_f32)

    return out2.reshape(orig_shape)


if __name__ == "__main__":
    key = jax.random.PRNGKey(0)

    def make_inputs(k, lead_shape, dim, scale):
        kx, kw1, kb1, kw2, kb2 = jax.random.split(k, 5)
        x = jax.random.normal(kx, lead_shape + (dim,), dtype=jnp.float32)
        w1 = jax.random.normal(kw1, (dim, dim), dtype=jnp.float32) * scale
        b1 = jax.random.normal(kb1, (dim,), dtype=jnp.float32) * scale
        w2 = jax.random.normal(kw2, (dim, dim), dtype=jnp.float32) * scale
        b2 = jax.random.normal(kb2, (dim,), dtype=jnp.float32) * scale
        return x, w1, b1, w2, b2

    def ref_fn(x, w1, b1, w2, b2):
        # Pure-JAX reference mirroring the PyTorch forward (dropout = identity).
        h = jax.nn.relu(jnp.einsum("...d,od->...o", x, w1) + b1)
        return jnp.einsum("...d,od->...o", h, w2) + b2 + x

    k1, k2 = jax.random.split(key)

    # 1) Small shape (resident-weight path): batch=2, seq=8, hidden=32.
    x, w1, b1, w2, b2 = make_inputs(k1, (2, 8), 32, 0.1)
    out = res_block(x, w1, b1, w2, b2)
    jax.block_until_ready(out)
    assert out.shape == x.shape and out.dtype == x.dtype
    assert jnp.allclose(out, ref_fn(x, w1, b1, w2, b2), atol=1e-5, rtol=1e-5)

    # 2) Lane-aligned decode-like shape exercising the hidden-dim tiled path
    #    (rows=16, dim=1024 -> tiled grid with 4 hidden tiles + f32 accumulator).
    xt, w1t, b1t, w2t, b2t = make_inputs(k2, (2, 8), 1024, 0.03)
    out_t = res_block(xt, w1t, b1t, w2t, b2t)
    jax.block_until_ready(out_t)
    assert out_t.shape == xt.shape and out_t.dtype == xt.dtype
    # Looser tolerance: default MXU matmul precision / accumulation order can
    # differ slightly from the XLA reference at this contraction size.
    assert jnp.allclose(out_t, ref_fn(xt, w1t, b1t, w2t, b2t), atol=5e-2, rtol=5e-2)

    print("KERNEL_OK")
</pallas_src>

<mosaic_0001>
module attributes {stable_mosaic.version = 11 : i64} {
  func.func @_resblock_resident_kernel(%arg0: i32, %arg1: memref<16x32xf32, #tpu.memory_space<vmem>>, %arg2: memref<32x32xf32, #tpu.memory_space<vmem>>, %arg3: memref<1x32xf32, #tpu.memory_space<vmem>>, %arg4: memref<32x32xf32, #tpu.memory_space<vmem>>, %arg5: memref<1x32xf32, #tpu.memory_space<vmem>>, %arg6: memref<16x32xf32, #tpu.memory_space<vmem>>) attributes {dimension_semantics = [#tpu.dimension_semantics<parallel>], iteration_bounds = array<i64: 1>, scalar_prefetch = 0 : i64, scratch_operands = 0 : i64, tpu.core_type = #tpu.core_type<tc>, window_params = [{transform_indices = @transform_0, window_bounds = array<i64: 16, 32>}, {pipeline_mode = #tpu.pipeline_mode<synchronous>, transform_indices = @transform_1, window_bounds = array<i64: 32, 32>}, {pipeline_mode = #tpu.pipeline_mode<synchronous>, transform_indices = @transform_2, window_bounds = array<i64: 1, 32>}, {pipeline_mode = #tpu.pipeline_mode<synchronous>, transform_indices = @transform_3, window_bounds = array<i64: 32, 32>}, {pipeline_mode = #tpu.pipeline_mode<synchronous>, transform_indices = @transform_4, window_bounds = array<i64: 1, 32>}, {transform_indices = @transform_5, window_bounds = array<i64: 16, 32>}]} {
    %c0 = arith.constant 0 : index
    %c0_0 = arith.constant 0 : index
    %0 = vector.load %arg1[%c0, %c0_0] : memref<16x32xf32, #tpu.memory_space<vmem>>, vector<16x32xf32>
    %c0_1 = arith.constant 0 : index
    %c0_2 = arith.constant 0 : index
    %1 = vector.load %arg2[%c0_1, %c0_2] : memref<32x32xf32, #tpu.memory_space<vmem>>, vector<32x32xf32>
    %cst = arith.constant dense<0.000000e+00> : vector<16x32xf32>
    %2 = tpu.matmul %0, %1, %cst {dimension_numbers = #tpu.dot_dimension_numbers<[1], [0], [0], [1], [0, 0, 1, 1], [], []>} : vector<16x32xf32>, vector<32x32xf32>, vector<16x32xf32> -> vector<16x32xf32>
    %c0_3 = arith.constant 0 : index
    %c0_4 = arith.constant 0 : index
    %3 = vector.load %arg3[%c0_3, %c0_4] : memref<1x32xf32, #tpu.memory_space<vmem>>, vector<1x32xf32>
    %4 = vector.broadcast %3 : vector<1x32xf32> to vector<16x32xf32>
    %5 = arith.addf %2, %4 : vector<16x32xf32>
    %cst_5 = arith.constant 0.000000e+00 : f32
    %6 = vector.broadcast %cst_5 : f32 to vector<16x32xf32>
    %7 = arith.maximumf %5, %6 : vector<16x32xf32>
    %c0_6 = arith.constant 0 : index
    %c0_7 = arith.constant 0 : index
    %8 = vector.load %arg4[%c0_6, %c0_7] : memref<32x32xf32, #tpu.memory_space<vmem>>, vector<32x32xf32>
    %cst_8 = arith.constant dense<0.000000e+00> : vector<16x32xf32>
    %9 = tpu.matmul %7, %8, %cst_8 {dimension_numbers = #tpu.dot_dimension_numbers<[1], [0], [0], [1], [0, 0, 1, 1], [], []>} : vector<16x32xf32>, vector<32x32xf32>, vector<16x32xf32> -> vector<16x32xf32>
    %c0_9 = arith.constant 0 : index
    %c0_10 = arith.constant 0 : index
    %10 = vector.load %arg5[%c0_9, %c0_10] : memref<1x32xf32, #tpu.memory_space<vmem>>, vector<1x32xf32>
    %11 = vector.broadcast %10 : vector<1x32xf32> to vector<16x32xf32>
    %12 = arith.addf %9, %11 : vector<16x32xf32>
    %13 = arith.addf %12, %0 : vector<16x32xf32>
    %c0_11 = arith.constant 0 : index
    %c0_12 = arith.constant 0 : index
    %14 = vector.load %arg6[%c0_11, %c0_12] : memref<16x32xf32, #tpu.memory_space<vmem>>, vector<16x32xf32>
    tpu.vector_store %arg6[%c0_11, %c0_12], %13 {strides = array<i32>} : memref<16x32xf32, #tpu.memory_space<vmem>>, vector<16x32xf32>,
    return
  }
  func.func @transform_0(%arg0: i32) -> (i32, i32) {
    %c0_i32 = arith.constant 0 : i32
    %c0_i32_0 = arith.constant 0 : i32
    return %arg0, %c0_i32 : i32, i32
  }
  func.func @transform_1(%arg0: i32) -> (i32, i32) {
    %c0_i32 = arith.constant 0 : i32
    %c0_i32_0 = arith.constant 0 : i32
    %c0_i32_1 = arith.constant 0 : i32
    return %c0_i32, %c0_i32_0 : i32, i32
  }
  func.func @transform_2(%arg0: i32) -> (i32, i32) {
    %c0_i32 = arith.constant 0 : i32
    %c0_i32_0 = arith.constant 0 : i32
    %c0_i32_1 = arith.constant 0 : i32
    return %c0_i32, %c0_i32_0 : i32, i32
  }
  func.func @transform_3(%arg0: i32) -> (i32, i32) {
    %c0_i32 = arith.constant 0 : i32
    %c0_i32_0 = arith.constant 0 : i32
    %c0_i32_1 = arith.constant 0 : i32
    return %c0_i32, %c0_i32_0 : i32, i32
  }
  func.func @transform_4(%arg0: i32) -> (i32, i32) {
    %c0_i32 = arith.constant 0 : i32
    %c0_i32_0 = arith.constant 0 : i32
    %c0_i32_1 = arith.constant 0 : i32
    return %c0_i32, %c0_i32_0 : i32, i32
  }
  func.func @transform_5(%arg0: i32) -> (i32, i32) {
    %c0_i32 = arith.constant 0 : i32
    %c0_i32_0 = arith.constant 0 : i32
    return %arg0, %c0_i32 : i32, i32
  }
}

</mosaic_0001>

<bundles_post_ra>
// kernel: tpu_custom_call.1
= control target key start
LH: loop header
LB: loop body
LE: loop exit
PB: predicated region body
PF: predicated region fallthrough
CT: control target
= control target key end

     0   :  { %10 = vsyncpa [#allocation3], 0  ;;  %s365_s0 = inlined_call_operand.hbm [shape: f32[16,32], index: 0, kind: input, shape index: {}]   ;;  %s366_s1 = inlined_call_operand.hbm [shape: f32[32,32], index: 1, kind: input, shape index: {}]   ;;  %s367_s2 = inlined_call_operand.vmem [shape: f32[1,32], index: 2, kind: input, shape index: {}]   ;;  %s368_s3 = inlined_call_operand.hbm [shape: f32[32,32], index: 3, kind: input, shape index: {}]   ;;  %s369_s4 = inlined_call_operand.vmem [shape: f32[1,32], index: 4, kind: input, shape index: {}]   ;;  %s370_s5 = inlined_call_operand.hbm [shape: f32[16,32], index: 5, kind: output, shape index: {}]  }
   0x1   :  { %11 = vsyncpa [#allocation6], 0 }
   0x2   :  { %12 = vsyncpa [#allocation4], 0  ;;  %s30_s20 = sshll.u32 %s366_s1, 4  ;;  %s293_s21 = smov [#allocation5]   ;;  %s31_s20 = int_to_ptr.hbm [resolvable:$true] %s30_s20 }
   0x3   :  { %s32_s22 = sshll.u32 %s293_s21, 4  ;;  %s17_s25 = sshll.u32 %s365_s0, 4  ;;  %s33_s22 = int_to_ptr.vmem [resolvable:$true] %s32_s22  ;;  %s18_s25 = int_to_ptr.hbm [resolvable:$true] %s17_s25 }
   0x4   :  { %s294_s26 = smov 128   ;;  %s295_s27 = smov 8  }
   0x5   :  { %38 = dma.hbm_to_vmem [thread:$0]  %s31_s20, 512, %s33_s22, [#allocation6], %s294_s26, %s294_s26, %s295_s27  }
   0x6   :  { %s296_s28 = smov [#allocation2]   ;;  %s45_s1 = sshll.u32 %s368_s3, 4  ;;  %s46_s1 = int_to_ptr.hbm [resolvable:$true] %s45_s1 }
   0x7   :  { %s19_s29 = sshll.u32 %s296_s28, 4  ;;  %s297_s0 = smov [#allocation7]   ;;  %s20_s29 = int_to_ptr.vmem [resolvable:$true] %s19_s29 }
   0x8   :  { %25 = dma.hbm_to_vmem [thread:$0]  %s18_s25, 256, %s20_s29, [#allocation3], %s294_s26, %s294_s26, %s295_s27  }
   0x9   :  { %s47_s7 = sshll.u32 %s297_s0, 4  ;;  %s48_s7 = int_to_ptr.vmem [resolvable:$true] %s47_s7 }
   0xa   :  { %53 = dma.hbm_to_vmem [thread:$0]  %s46_s1, 512, %s48_s7, [#allocation6], %s294_s26, %s294_s26, %s295_s27  }
   0xb   :  { %287 = dma.done.wait [#allocation3], 256  }
   0xc   :  { %288 = vsyncadd [#allocation3], 4294967040 }
   0xd   :  { %289 = dma.done.wait [#allocation6], 1024  }
   0xe   :  { %290 = vsyncadd [#allocation6], 4294966272  ;;  %v73_v0 = vld [vmem:[#allocation5 + $0x18] sm:$0xff]  ;;  %v72_v1 = vld [vmem:[#allocation5 + $0x10] sm:$0xff]  ;;  %vm78_vm0 = vcmask 261120   ;;  %s157_s14 = sshll.u32 %s370_s5, 4  ;;  %s158_s14 = int_to_ptr.hbm [resolvable:$true] %s157_s14 }
   0xf   :  { %175 = vmatpush.msra.mxu2 %v73_v0  ;;  %97 = vmatpush.msra.mxu0 %v73_v0  ;;  %v71_v2 = vld [vmem:[#allocation5 + $0x8] sm:$0xff]  ;;  %v113_v3 = vld [vmem:[#allocation7 + $0x18] sm:$0xff]  ;;  %v70_v4 = vld [vmem:[#allocation5] sm:$0xff] }
  0x10   :  { %179 = vmatpush.msra.mxu3 %v113_v3  ;;  %136 = vmatpush.msra.mxu1 %v113_v3  ;;  %v69_v5 = vld [vmem:[#allocation2 + $0x8] sm:$0xff]  ;;  %v68_v6 = vld [vmem:[#allocation2] sm:$0xff]  ;;  %v111_v8 = vld [vmem:[#allocation7 + $0x8] sm:$0xff] }
  0x11   :  { %176 = vmatpush.msra.mxu2 %v72_v1  ;;  %98 = vmatpush.msra.mxu0 %v72_v1  ;;  %v112_v7 = vld [vmem:[#allocation7 + $0x10] sm:$0xff]  ;;  %v110_v9 = vld [vmem:[#allocation7] sm:$0xff] }
  0x12   :  { %180 = vmatpush.msra.mxu3 %v112_v7  ;;  %137 = vmatpush.msra.mxu1 %v112_v7  ;;  %v189_v10 = vld [vmem:[%s367_s2] ss:$0 sm:$0xff]  ;;  %s298_s2 = smov [#allocation8]  }
  0x13   :  { %177 = vmatpush.msra.mxu2 %v71_v2  ;;  %99 = vmatpush.msra.mxu0 %v71_v2  ;;  %v190_v17 = vld [vmem:[%s369_s4] ss:$0 sm:$0xff]  ;;  %s155_s11 = sshll.u32 %s298_s2, 4  ;;  %s156_s11 = int_to_ptr.vmem [resolvable:$true] %s155_s11 }
  0x14   :  { %181 = vmatpush.msra.mxu3 %v111_v8  ;;  %138 = vmatpush.msra.mxu1 %v111_v8 }
  0x15   :  { %178 = vmatpush.msra.mxu2 %v70_v4  ;;  %100 = vmatpush.msra.mxu0 %v70_v4 }
  0x16   :  { %172 = vmatmul.msk.f32.vlgmr.msra.gmra.mxu2 %vm78_vm0, %v69_v5  ;;  %171 = vmatmul.msk.f32.vlgmr.msra.gmra.mxu0 %vm78_vm0, %v68_v6 }
  0x17   :  { %182 = vmatpush.msra.mxu3 %v110_v9  ;;  %139 = vmatpush.msra.mxu1 %v110_v9 }
  0x93   :  { %v102_v11 = vpop.f32.mrf.mxu0 }
  0x94   :  { %v103_v12 = vadd.f32 %v189_v10, %v102_v11 }
  0x96   :  { %v108_v13 = vmax.f32 %v103_v12, 0.0 }
  0x98   :  { %173 = vmatmul.msk.f32.vlgmr.msra.gmra.mxu1 %vm78_vm0, %v108_v13 }
  0x99   :  { %v105_v14 = vpop.f32.mrf.mxu2 }
  0x9a   :  { %v106_v15 = vadd.f32 %v189_v10, %v105_v14 }
  0x9c   :  { %v109_v16 = vmax.f32 %v106_v15, 0.0 }
  0x9e   :  { %174 = vmatmul.msk.f32.vlgmr.msra.gmra.mxu3 %vm78_vm0, %v109_v16 }
 0x115   :  { %v141_v18 = vpop.f32.mrf.mxu1 }
 0x116   :  { %v142_v19 = vadd.f32 %v190_v17, %v141_v18 }
 0x118   :  { %v147_v20 = vadd.f32 %v142_v19, %v68_v6 }
 0x11a   :  { %149 = vst.msk [vmem:[#allocation8] sm:$0xff] %vm78_vm0, %v147_v20 }
 0x121   :  { %v144_v21 = vpop.f32.mrf.mxu3 }
 0x122   :  { %v145_v22 = vadd.f32 %v190_v17, %v144_v21 }
 0x124   :  { %v148_v23 = vadd.f32 %v145_v22, %v69_v5 }
 0x126   :  { %150 = vst.msk [vmem:[#allocation8 + $0x8] sm:$0xff] %vm78_vm0, %v148_v23 }
 0x127   :  { %163 = dma.vmem_to_hbm [thread:$0]  %s156_s11, 256, %s158_s14, [#allocation4], %s294_s26, %s294_s26, %s295_s27  }
 0x128   :  { %291 = dma.done.wait [#allocation4], 256  }
 0x129   :  { %292 = vsyncadd [#allocation4], 4294967040 }
 0x12a   :  { %168 = vsyncpa [#allocation3], 1 }
 0x12b   :  { %169 = vsyncpa [#allocation6], 1 }
 0x12c   :  { %170 = vsyncpa [#allocation4], 1 }

</bundles_post_ra>
